<compile_context>
chip_gen: v6e
topology: v6e:2x2x1
jax: 0.10.0
libtpu: 0.0.40
codegen_flags: <defaults>
</compile_context>

<pallas_src>
import jax
import jax.numpy as jnp
from jax import lax
from jax.experimental import pallas as pl
from jax.experimental.pallas import tpu as pltpu

head_size = 16
n_embd = 384
num_heads = 4   # module takes num_heads as a constructor arg; small choice for test


def _mha_fused_kernel(x_ref, w_ref, o_ref):
    # x_ref : (1, T, C)          one batch row of x
    # w_ref : (C, 3*H*hs)        packed [Q_all | K_all | V_all] weights (head-major)
    # o_ref : (1, T, H*hs)       lane-dense output block for batch b
    x = x_ref[0]                                  # (T, C)
    w = w_ref[...]                                # (C, 3*H*hs)

    T = x.shape[0]
    D = o_ref.shape[-1]                           # H*hs
    hs = head_size
    H = D // hs

    # One wide MXU matmul for all heads and all of Q/K/V.
    qkv = jnp.dot(x, w, preferred_element_type=jnp.float32)   # (T, 3*H*hs)
    q_all = qkv[:, 0:D]                           # (T, H*hs), head-major columns
    k_all = qkv[:, D:2 * D]
    v_all = qkv[:, 2 * D:3 * D]

    # Causal mask (hoisted out of the head loop).
    row = lax.broadcasted_iota(jnp.int32, (T, T), 0)
    col = lax.broadcasted_iota(jnp.int32, (T, T), 1)
    causal = col <= row
    scale = jnp.float32(hs) ** -0.5
    neg_inf = jnp.float32(-jnp.inf)

    outs = []
    for h in range(H):                            # static unroll over heads
        sl = slice(h * hs, (h + 1) * hs)
        q = q_all[:, sl]                          # (T, hs)
        k = k_all[:, sl]
        v = v_all[:, sl]

        # q @ k^T without an explicit transpose of k (contract last dims).
        s = lax.dot_general(q, k, (((1,), (1,)), ((), ())),
                            preferred_element_type=jnp.float32) * scale  # (T, T)
        s = jnp.where(causal, s, neg_inf)

        # Softmax in f32; diagonal is never masked so every row has a finite max.
        m = jnp.max(s, axis=-1, keepdims=True)
        e = jnp.exp(s - m)
        denom = jnp.sum(e, axis=-1, keepdims=True)
        p = e * pl.reciprocal(denom, approx=True)                 # EUP divide

        outs.append(jnp.dot(p, v, preferred_element_type=jnp.float32))  # (T, hs)

    # torch.cat([...], dim=-1): head-major concatenation along lanes.
    o_ref[0] = jnp.concatenate(outs, axis=-1).astype(o_ref.dtype)


def multi_head_attention(x, wk, wq, wv):
    # x : (B, T, C) float32
    # wk/wq/wv : (H, C, hs) float32  (pre-transposed nn.Linear weights: x @ w[h])
    B, T, C = x.shape
    H, _, hs = wk.shape
    D = H * hs

    # Pack into one (C, 3*H*hs) weight slab: [Q_all | K_all | V_all], head-major.
    def head_major(w):                            # (H, C, hs) -> (C, H*hs)
        return jnp.transpose(w, (1, 0, 2)).reshape(C, H * hs)

    w_qkv = jnp.concatenate(
        [head_major(wq), head_major(wk), head_major(wv)], axis=-1)  # (C, 3*H*hs)

    return pl.pallas_call(
        _mha_fused_kernel,
        out_shape=jax.ShapeDtypeStruct((B, T, D), x.dtype),
        grid_spec=pltpu.PrefetchScalarGridSpec(
            num_scalar_prefetch=0,
            grid=(B,),
            in_specs=[
                pl.BlockSpec((1, T, C), lambda b: (b, 0, 0)),
                pl.BlockSpec((C, 3 * D), lambda b: (0, 0)),   # fetched once, reused
            ],
            out_specs=pl.BlockSpec((1, T, D), lambda b: (b, 0, 0)),
        ),
        compiler_params=pltpu.CompilerParams(
            dimension_semantics=("parallel",)
        ),
    )(x, w_qkv)


def _reference(x, wk, wq, wv):
    # pure-JAX reference for sanity check
    outs = []
    for h in range(wk.shape[0]):
        k = x @ wk[h]
        q = x @ wq[h]
        v = x @ wv[h]
        wei = (q @ jnp.swapaxes(k, -2, -1)) * (k.shape[-1] ** -0.5)
        T = x.shape[1]
        mask = jnp.tril(jnp.ones((T, T)))
        wei = jnp.where(mask == 0, -jnp.inf, wei)
        wei = jax.nn.softmax(wei, axis=-1)
        outs.append(wei @ v)
    return jnp.concatenate(outs, axis=-1)


if __name__ == "__main__":
    key = jax.random.PRNGKey(0)
    kx, kk, kq, kv = jax.random.split(key, 4)

    B, T = 2, 8
    x = jax.random.normal(kx, (B, T, n_embd), dtype=jnp.float32)

    # Deterministic parameter init (shapes per nn.Linear(n_embd, head_size, bias=False),
    # stored pre-transposed as (H, n_embd, head_size)).
    bound = 1.0 / (n_embd ** 0.5)
    wk = jax.random.uniform(kk, (num_heads, n_embd, head_size), jnp.float32, -bound, bound)
    wq = jax.random.uniform(kq, (num_heads, n_embd, head_size), jnp.float32, -bound, bound)
    wv = jax.random.uniform(kv, (num_heads, n_embd, head_size), jnp.float32, -bound, bound)

    out = jax.block_until_ready(multi_head_attention(x, wk, wq, wv))

    ref = _reference(x, wk, wq, wv)
    assert out.shape == (B, T, num_heads * head_size)
    # Tolerance slightly relaxed vs exact divide because the softmax denominator
    # uses the EUP approximate reciprocal (structural bugs would be O(1) errors).
    assert jnp.allclose(out, ref, atol=2e-3, rtol=2e-3)
    assert bool(jnp.all(jnp.isfinite(out)))

    print("KERNEL_OK")
</pallas_src>

<mosaic_0001>
module attributes {stable_mosaic.version = 11 : i64} {
  func.func @_mha_fused_kernel(%arg0: i32, %arg1: memref<1x8x384xf32, #tpu.memory_space<vmem>>, %arg2: memref<384x192xf32, #tpu.memory_space<vmem>>, %arg3: memref<1x8x64xf32, #tpu.memory_space<vmem>>) attributes {dimension_semantics = [#tpu.dimension_semantics<parallel>], iteration_bounds = array<i64: 2>, scalar_prefetch = 0 : i64, scratch_operands = 0 : i64, tpu.core_type = #tpu.core_type<tc>, window_params = [{transform_indices = @transform_0, window_bounds = array<i64: 1, 8, 384>}, {pipeline_mode = #tpu.pipeline_mode<synchronous>, transform_indices = @transform_1, window_bounds = array<i64: 384, 192>}, {transform_indices = @transform_2, window_bounds = array<i64: 1, 8, 64>}]} {
    %c0 = arith.constant 0 : index
    %c0_0 = arith.constant 0 : index
    %c0_1 = arith.constant 0 : index
    %0 = vector.load %arg1[%c0, %c0_0, %c0_1] : memref<1x8x384xf32, #tpu.memory_space<vmem>>, vector<1x8x384xf32>
    %1 = vector.shape_cast %0 : vector<1x8x384xf32> to vector<8x384xf32>
    %c0_2 = arith.constant 0 : index
    %c0_3 = arith.constant 0 : index
    %2 = vector.load %arg2[%c0_2, %c0_3] : memref<384x192xf32, #tpu.memory_space<vmem>>, vector<384x192xf32>
    %cst = arith.constant dense<0.000000e+00> : vector<8x192xf32>
    %3 = tpu.matmul %1, %2, %cst {dimension_numbers = #tpu.dot_dimension_numbers<[1], [0], [0], [1], [0, 0, 1, 1], [], []>} : vector<8x384xf32>, vector<384x192xf32>, vector<8x192xf32> -> vector<8x192xf32>
    %4 = vector.extract_strided_slice %3 {offsets = [0, 0], sizes = [8, 64], strides = [1, 1]} : vector<8x192xf32> to vector<8x64xf32>
    %5 = vector.extract_strided_slice %3 {offsets = [0, 64], sizes = [8, 64], strides = [1, 1]} : vector<8x192xf32> to vector<8x64xf32>
    %6 = vector.extract_strided_slice %3 {offsets = [0, 128], sizes = [8, 64], strides = [1, 1]} : vector<8x192xf32> to vector<8x64xf32>
    %7 = tpu.iota {dimensions = array<i32: 0>} : vector<8x8xi32>
    %8 = tpu.iota {dimensions = array<i32: 1>} : vector<8x8xi32>
    %9 = arith.cmpi sle, %8, %7 : vector<8x8xi32>
    %cst_4 = arith.constant 1.600000e+01 : f32
    %cst_5 = arith.constant -5.000000e-01 : f32
    %10 = math.powf %cst_4, %cst_5 : f32
    %11 = vector.extract_strided_slice %4 {offsets = [0, 0], sizes = [8, 16], strides = [1, 1]} : vector<8x64xf32> to vector<8x16xf32>
    %12 = vector.extract_strided_slice %5 {offsets = [0, 0], sizes = [8, 16], strides = [1, 1]} : vector<8x64xf32> to vector<8x16xf32>
    %13 = vector.extract_strided_slice %6 {offsets = [0, 0], sizes = [8, 16], strides = [1, 1]} : vector<8x64xf32> to vector<8x16xf32>
    %cst_6 = arith.constant dense<0.000000e+00> : vector<8x8xf32>
    %14 = tpu.matmul %11, %12, %cst_6 {dimension_numbers = #tpu.dot_dimension_numbers<[1], [1], [0], [0], [0, 0, 1, 0], [], []>} : vector<8x16xf32>, vector<8x16xf32>, vector<8x8xf32> -> vector<8x8xf32>
    %15 = vector.broadcast %10 : f32 to vector<8x8xf32>
    %16 = arith.mulf %14, %15 : vector<8x8xf32>
    %cst_7 = arith.constant 0xFF800000 : f32
    %17 = vector.broadcast %cst_7 : f32 to vector<8x8xf32>
    %18 = arith.select %9, %16, %17 : vector<8x8xi1>, vector<8x8xf32>
    %cst_8 = arith.constant dense<0xFF800000> : vector<8xf32>
    %19 = vector.multi_reduction <maximumf>, %18, %cst_8 [1] : vector<8x8xf32> to vector<8xf32>
    %20 = vector.shape_cast %19 : vector<8xf32> to vector<8x1xf32>
    %21 = vector.broadcast %20 : vector<8x1xf32> to vector<8x8xf32>
    %22 = arith.subf %18, %21 : vector<8x8xf32>
    %23 = math.exp %22 : vector<8x8xf32>
    %cst_9 = arith.constant dense<0.000000e+00> : vector<8xf32>
    %24 = vector.multi_reduction <add>, %23, %cst_9 [1] : vector<8x8xf32> to vector<8xf32>
    %25 = vector.shape_cast %24 : vector<8xf32> to vector<8x1xf32>
    %26 = tpu.reciprocal %25 {approx = true} : vector<8x1xf32> -> vector<8x1xf32>
    %27 = vector.broadcast %26 : vector<8x1xf32> to vector<8x8xf32>
    %28 = arith.mulf %23, %27 : vector<8x8xf32>
    %cst_10 = arith.constant dense<0.000000e+00> : vector<8x16xf32>
    %29 = tpu.matmul %28, %13, %cst_10 {dimension_numbers = #tpu.dot_dimension_numbers<[1], [0], [0], [1], [0, 0, 1, 1], [], []>} : vector<8x8xf32>, vector<8x16xf32>, vector<8x16xf32> -> vector<8x16xf32>
    %30 = vector.extract_strided_slice %4 {offsets = [0, 16], sizes = [8, 16], strides = [1, 1]} : vector<8x64xf32> to vector<8x16xf32>
    %31 = vector.extract_strided_slice %5 {offsets = [0, 16], sizes = [8, 16], strides = [1, 1]} : vector<8x64xf32> to vector<8x16xf32>
    %32 = vector.extract_strided_slice %6 {offsets = [0, 16], sizes = [8, 16], strides = [1, 1]} : vector<8x64xf32> to vector<8x16xf32>
    %cst_11 = arith.constant dense<0.000000e+00> : vector<8x8xf32>
    %33 = tpu.matmul %30, %31, %cst_11 {dimension_numbers = #tpu.dot_dimension_numbers<[1], [1], [0], [0], [0, 0, 1, 0], [], []>} : vector<8x16xf32>, vector<8x16xf32>, vector<8x8xf32> -> vector<8x8xf32>
    %34 = vector.broadcast %10 : f32 to vector<8x8xf32>
    %35 = arith.mulf %33, %34 : vector<8x8xf32>
    %cst_12 = arith.constant 0xFF800000 : f32
    %36 = vector.broadcast %cst_12 : f32 to vector<8x8xf32>
    %37 = arith.select %9, %35, %36 : vector<8x8xi1>, vector<8x8xf32>
    %cst_13 = arith.constant dense<0xFF800000> : vector<8xf32>
    %38 = vector.multi_reduction <maximumf>, %37, %cst_13 [1] : vector<8x8xf32> to vector<8xf32>
    %39 = vector.shape_cast %38 : vector<8xf32> to vector<8x1xf32>
    %40 = vector.broadcast %39 : vector<8x1xf32> to vector<8x8xf32>
    %41 = arith.subf %37, %40 : vector<8x8xf32>
    %42 = math.exp %41 : vector<8x8xf32>
    %cst_14 = arith.constant dense<0.000000e+00> : vector<8xf32>
    %43 = vector.multi_reduction <add>, %42, %cst_14 [1] : vector<8x8xf32> to vector<8xf32>
    %44 = vector.shape_cast %43 : vector<8xf32> to vector<8x1xf32>
    %45 = tpu.reciprocal %44 {approx = true} : vector<8x1xf32> -> vector<8x1xf32>
    %46 = vector.broadcast %45 : vector<8x1xf32> to vector<8x8xf32>
    %47 = arith.mulf %42, %46 : vector<8x8xf32>
    %cst_15 = arith.constant dense<0.000000e+00> : vector<8x16xf32>
    %48 = tpu.matmul %47, %32, %cst_15 {dimension_numbers = #tpu.dot_dimension_numbers<[1], [0], [0], [1], [0, 0, 1, 1], [], []>} : vector<8x8xf32>, vector<8x16xf32>, vector<8x16xf32> -> vector<8x16xf32>
    %49 = vector.extract_strided_slice %4 {offsets = [0, 32], sizes = [8, 16], strides = [1, 1]} : vector<8x64xf32> to vector<8x16xf32>
    %50 = vector.extract_strided_slice %5 {offsets = [0, 32], sizes = [8, 16], strides = [1, 1]} : vector<8x64xf32> to vector<8x16xf32>
    %51 = vector.extract_strided_slice %6 {offsets = [0, 32], sizes = [8, 16], strides = [1, 1]} : vector<8x64xf32> to vector<8x16xf32>
    %cst_16 = arith.constant dense<0.000000e+00> : vector<8x8xf32>
    %52 = tpu.matmul %49, %50, %cst_16 {dimension_numbers = #tpu.dot_dimension_numbers<[1], [1], [0], [0], [0, 0, 1, 0], [], []>} : vector<8x16xf32>, vector<8x16xf32>, vector<8x8xf32> -> vector<8x8xf32>
    %53 = vector.broadcast %10 : f32 to vector<8x8xf32>
    %54 = arith.mulf %52, %53 : vector<8x8xf32>
    %cst_17 = arith.constant 0xFF800000 : f32
    %55 = vector.broadcast %cst_17 : f32 to vector<8x8xf32>
    %56 = arith.select %9, %54, %55 : vector<8x8xi1>, vector<8x8xf32>
    %cst_18 = arith.constant dense<0xFF800000> : vector<8xf32>
    %57 = vector.multi_reduction <maximumf>, %56, %cst_18 [1] : vector<8x8xf32> to vector<8xf32>
    %58 = vector.shape_cast %57 : vector<8xf32> to vector<8x1xf32>
    %59 = vector.broadcast %58 : vector<8x1xf32> to vector<8x8xf32>
    %60 = arith.subf %56, %59 : vector<8x8xf32>
    %61 = math.exp %60 : vector<8x8xf32>
    %cst_19 = arith.constant dense<0.000000e+00> : vector<8xf32>
    %62 = vector.multi_reduction <add>, %61, %cst_19 [1] : vector<8x8xf32> to vector<8xf32>
    %63 = vector.shape_cast %62 : vector<8xf32> to vector<8x1xf32>
    %64 = tpu.reciprocal %63 {approx = true} : vector<8x1xf32> -> vector<8x1xf32>
    %65 = vector.broadcast %64 : vector<8x1xf32> to vector<8x8xf32>
    %66 = arith.mulf %61, %65 : vector<8x8xf32>
    %cst_20 = arith.constant dense<0.000000e+00> : vector<8x16xf32>
    %67 = tpu.matmul %66, %51, %cst_20 {dimension_numbers = #tpu.dot_dimension_numbers<[1], [0], [0], [1], [0, 0, 1, 1], [], []>} : vector<8x8xf32>, vector<8x16xf32>, vector<8x16xf32> -> vector<8x16xf32>
    %68 = vector.extract_strided_slice %4 {offsets = [0, 48], sizes = [8, 16], strides = [1, 1]} : vector<8x64xf32> to vector<8x16xf32>
    %69 = vector.extract_strided_slice %5 {offsets = [0, 48], sizes = [8, 16], strides = [1, 1]} : vector<8x64xf32> to vector<8x16xf32>
    %70 = vector.extract_strided_slice %6 {offsets = [0, 48], sizes = [8, 16], strides = [1, 1]} : vector<8x64xf32> to vector<8x16xf32>
    %cst_21 = arith.constant dense<0.000000e+00> : vector<8x8xf32>
    %71 = tpu.matmul %68, %69, %cst_21 {dimension_numbers = #tpu.dot_dimension_numbers<[1], [1], [0], [0], [0, 0, 1, 0], [], []>} : vector<8x16xf32>, vector<8x16xf32>, vector<8x8xf32> -> vector<8x8xf32>
    %72 = vector.broadcast %10 : f32 to vector<8x8xf32>
    %73 = arith.mulf %71, %72 : vector<8x8xf32>
    %cst_22 = arith.constant 0xFF800000 : f32
    %74 = vector.broadcast %cst_22 : f32 to vector<8x8xf32>
    %75 = arith.select %9, %73, %74 : vector<8x8xi1>, vector<8x8xf32>
    %cst_23 = arith.constant dense<0xFF800000> : vector<8xf32>
    %76 = vector.multi_reduction <maximumf>, %75, %cst_23 [1] : vector<8x8xf32> to vector<8xf32>
    %77 = vector.shape_cast %76 : vector<8xf32> to vector<8x1xf32>
    %78 = vector.broadcast %77 : vector<8x1xf32> to vector<8x8xf32>
    %79 = arith.subf %75, %78 : vector<8x8xf32>
    %80 = math.exp %79 : vector<8x8xf32>
    %cst_24 = arith.constant dense<0.000000e+00> : vector<8xf32>
    %81 = vector.multi_reduction <add>, %80, %cst_24 [1] : vector<8x8xf32> to vector<8xf32>
    %82 = vector.shape_cast %81 : vector<8xf32> to vector<8x1xf32>
    %83 = tpu.reciprocal %82 {approx = true} : vector<8x1xf32> -> vector<8x1xf32>
    %84 = vector.broadcast %83 : vector<8x1xf32> to vector<8x8xf32>
    %85 = arith.mulf %80, %84 : vector<8x8xf32>
    %cst_25 = arith.constant dense<0.000000e+00> : vector<8x16xf32>
    %86 = tpu.matmul %85, %70, %cst_25 {dimension_numbers = #tpu.dot_dimension_numbers<[1], [0], [0], [1], [0, 0, 1, 1], [], []>} : vector<8x8xf32>, vector<8x16xf32>, vector<8x16xf32> -> vector<8x16xf32>
    %87 = tpu.concatenate %29, %48, %67, %86 in 1 : vector<8x16xf32>, vector<8x16xf32>, vector<8x16xf32>, vector<8x16xf32> -> vector<8x64xf32>
    %c0_26 = arith.constant 0 : index
    %c0_27 = arith.constant 0 : index
    %c0_28 = arith.constant 0 : index
    %88 = vector.load %arg3[%c0_26, %c0_27, %c0_28] : memref<1x8x64xf32, #tpu.memory_space<vmem>>, vector<1x8x64xf32>
    %89 = vector.shape_cast %88 : vector<1x8x64xf32> to vector<8x64xf32>
    %90 = vector.shape_cast %87 : vector<8x64xf32> to vector<1x8x64xf32>
    tpu.vector_store %arg3[%c0_26, %c0_27, %c0_28], %90 {strides = array<i32>} : memref<1x8x64xf32, #tpu.memory_space<vmem>>, vector<1x8x64xf32>,
    return
  }
  func.func @transform_0(%arg0: i32) -> (i32, i32, i32) {
    %c0_i32 = arith.constant 0 : i32
    %c0_i32_0 = arith.constant 0 : i32
    %c0_i32_1 = arith.constant 0 : i32
    return %arg0, %c0_i32, %c0_i32_0 : i32, i32, i32
  }
  func.func @transform_1(%arg0: i32) -> (i32, i32) {
    %c0_i32 = arith.constant 0 : i32
    %c0_i32_0 = arith.constant 0 : i32
    %c0_i32_1 = arith.constant 0 : i32
    return %c0_i32, %c0_i32_0 : i32, i32
  }
  func.func @transform_2(%arg0: i32) -> (i32, i32, i32) {
    %c0_i32 = arith.constant 0 : i32
    %c0_i32_0 = arith.constant 0 : i32
    %c0_i32_1 = arith.constant 0 : i32
    return %arg0, %c0_i32, %c0_i32_0 : i32, i32, i32
  }
}

</mosaic_0001>

<bundles_post_ra>
// kernel: tpu_custom_call.1
= control target key start
LH: loop header
LB: loop body
LE: loop exit
PB: predicated region body
PF: predicated region fallthrough
CT: control target
= control target key end

     0   :  { %7 = vsyncpa [#allocation3], 0  ;;  %s1861_s0 = inlined_call_operand.vmem [shape: f32[2,8,384], index: 0, kind: input, shape index: {}]   ;;  %s1862_s1 = inlined_call_operand.vmem [shape: f32[384,192], index: 1, kind: input, shape index: {}]   ;;  %s1863_s2 = inlined_call_operand.hbm [shape: f32[2,8,64], index: 2, kind: output, shape index: {}]  }
   0x1   :  { %9 = vsyncpa [#allocation3 + $0x1], 0  ;;  %s1377_s9 = smov 0   ;;  %s1379_s10 = smov 0  }
   0x2   :  { %s1381_s11 = smov 0   ;;  %s1383_s12 = smov 0  }
   0x3 LB: > { %s1398_s13 = sadd.s32 4294967295, %s1350_s12   ;;  %s1147_s14 = sadd.s32 4294967294, %s1350_s12   ;;  %s1350_s12 = sphi %s1383_s12, %s1869_s12   ;;  %s1346_s11 = sphi %s1381_s11, %s1868_s11   ;;  %s1342_s10 = sphi %s1379_s10, %s1867_s10   ;;  %s1338_s9 = sphi %s1377_s9, %s1866_s9  }
   0x4   : > { %s1402_s15 = sadd.s32 1, %s1350_s12   ;;  %s69_s16 = sadd.s32 1, %s1346_s11 }
   0x5   : > { %s66_s17 = ssub.s32 %s1350_s12, %s1402_s15  ;;  %p79_p0 = scmp.ne.s32.totalorder %s1346_s11, %s1342_s10 }
   0x6   : > { %p67_p1 = scmp.eq.s32.totalorder %s66_s17, 0  ;;  %p80_p2 = scmp.eq.s32.totalorder %s1398_s13, 1 }
   0x7   : > { %p85_p3 = scmp.ne.s32.totalorder %s1342_s10, %s1338_s9  ;;  %p86_p4 = scmp.eq.s32.totalorder %s1147_s14, 1 }
   0x8   : > { %s1413_s18 = scalar_select %p67_p1, %s1346_s11, %s69_s16  }
   0x9   : > { %p1415_p5 = por %p80_p2, %p79_p0  ;;  %p1419_p6 = por %p86_p4, %p85_p3 }
   0xa   : > { %p1150_p7 = scmp.ge.s32.totalorder %s1350_s12, 1  ;;  %p115_p8 = scmp.lt.s32.totalorder %s1350_s12, 3 }
   0xc   : > { %p116_p9 = pnand %p1150_p7, %p115_p8 }
   0xd   : > { %p137_p10 = scmp.lt.s32.totalorder (!%p116_p9), %s1398_s13, 1  ;;  %s1354_s30 = smov (!%p116_p9), 48  }
   0xe   : > { %119 = sbr.rel (%p116_p9) target bundleno = 2763 (0xacb), region = 28  ;;  %s1355_s3 = smov (!%p116_p9), 64  }
   0xf   : > { %s1357_s7 = smov (!%p116_p9), 96   ;;  %s1358_s8 = smov (!%p116_p9), 32  }
  0x10   : > { %s1359_s14 = smov (!%p116_p9), 80   ;;  %s1360_s16 = smov (!%p116_p9), 16  }
  0x11   : > { %s134_s17 = sand.u32 (!%p116_p9), 1, %s1342_s10  }
  0x12   : > { %s1151_s21 = sshll.u32 (!%p116_p9), %s134_s17, 3  ;;  %s1075_s26 = scalar_lea.sflag (!%p116_p9), [#allocation3], %s134_s17 }
  0x13   : > { %v176_v0 = vld [vmem:[%s1862_s1 + $0xf8] sm:$0xff]  ;;  %v175_v1 = vld [vmem:[%s1862_s1 + $0xf0] sm:$0xff]  ;;  %v174_v2 = vld [vmem:[%s1862_s1 + $0xe8] sm:$0xff]  ;;  %v1352_v4 = vmov 0.0   ;;  %s1592_s6 = scalar_select %p137_p10, %s1398_s13, 1  ;;  %vm1353_vm0 = vmmov 0  }
  0x14   : > { %241 = vmatprep.subr.mxu0 %v176_v0  ;;  %v173_v3 = vld [vmem:[%s1862_s1 + $0xe0] sm:$0xff]  ;;  %376 = vmatprep.mubr.f32.mxu1 %v1352_v4  ;;  %v172_v5 = vld [vmem:[%s1862_s1 + $0xd8] sm:$0xff]  ;;  %v171_v6 = vld [vmem:[%s1862_s1 + $0xd0] sm:$0xff]  ;;  %vm391_vm1 = vcmask 130048   ;;  %vm468_vm3 = vcmask 64512   ;;  %vm1068_vm4 = vcmask 261120  }
  0x15   : > { %242 = vmatpush1.msra.mxu0 %v175_v1  ;;  %v170_v7 = vld [vmem:[%s1862_s1 + $0xc8] sm:$0xff]  ;;  %v169_v8 = vld [vmem:[%s1862_s1 + $0xc0] sm:$0xff]  ;;  %v168_v9 = vld [vmem:[%s1862_s1 + $0xb8] sm:$0xff]  ;;  %s1225_s4 = smul.u32 24, %s1592_s6  ;;  %s136_s22 = scalar_lea.vmem [#allocation2], %s1151_s21  ;;  %vm1070_vm5 = vcmask 392192  }
  0x16   : > { %243 = vmatprep.subr.mxu0 %v174_v2  ;;  %v167_v10 = vld [vmem:[%s1862_s1 + $0xb0] sm:$0xff]  ;;  %v166_v11 = vld [vmem:[%s1862_s1 + $0xa8] sm:$0xff]  ;;  %v165_v12 = vld [vmem:[%s1862_s1 + $0xa0] sm:$0xff]  ;;  %s1088_s6 = sshll.u32 %s136_s22, 4  ;;  %vm1072_vm6 = vcmask 523264   ;;  %s1089_s6 = int_to_ptr.vmem [resolvable:$true] %s1088_s6 }
  0x17   : > { %244 = vmatpush1.msra.mxu0 %v173_v3  ;;  %v164_v13 = vld [vmem:[%s1862_s1 + $0x98] sm:$0xff]  ;;  %v163_v15 = vld [vmem:[%s1862_s1 + $0x90] sm:$0xff]  ;;  %v238_v17 = vld [vmem:[%s1862_s1 + $0x2e8] sm:$0xff]  ;;  %s1646_s5 = scalar_lea.vmem %s1861_s0, %s1225_s4  ;;  %s1166_s4 = sshll.u32 %s1398_s13, 7 }
  0x18   : > { %245 = vmatprep.subr.mxu0 %v172_v5  ;;  %v240_v14 = vld [vmem:[%s1862_s1 + $0x2f8] sm:$0xff]  ;;  %v239_v16 = vld [vmem:[%s1862_s1 + $0x2f0] sm:$0xff]  ;;  %v162_v18 = vld [vmem:[%s1862_s1 + $0x88] sm:$0xff]  ;;  %s1826_s25 = scalar_lea.hbm %s1863_s2, %s1166_s4  ;;  %s1290_s27 = scalar_lea.vmem %s1089_s6, 128 }
  0x19   : > { %246 = vmatpush1.msra.mxu0 %v171_v6  ;;  %312 = vmatprep.subr.mxu1 %v240_v14  ;;  %v237_v19 = vld [vmem:[%s1862_s1 + $0x2e0] sm:$0xff]  ;;  %v236_v21 = vld [vmem:[%s1862_s1 + $0x2d8] sm:$0xff]  ;;  %v235_v22 = vld [vmem:[%s1862_s1 + $0x2d0] sm:$0xff]  ;;  %p1291_p11 = scmp.ne.s32.totalorder %s1089_s6, %s1290_s27  ;;  %s1361_s13 = smov [#allocation2]  }
  0x1a   : > { %247 = vmatprep.subr.mxu0 %v170_v7  ;;  %313 = vmatpush1.msra.mxu1 %v239_v16  ;;  %v161_v20 = vld [vmem:[%s1862_s1 + $0x80] sm:$0xff]  ;;  %v160_v23 = vld [vmem:[%s1862_s1 + $0x78] sm:$0xff]  ;;  %v234_v24 = vld [vmem:[%s1862_s1 + $0x2c8] sm:$0xff]  ;;  %s1294_s28 = sshll.u32 %s1361_s13, 4  ;;  %s1295_s28 = int_to_ptr.vmem [resolvable:$false] %s1294_s28 }
  0x1b   : > { %248 = vmatpush1.msra.mxu0 %v169_v8  ;;  %314 = vmatprep.subr.mxu1 %v238_v17  ;;  %v159_v25 = vld [vmem:[%s1862_s1 + $0x70] sm:$0xff]  ;;  %v233_v26 = vld [vmem:[%s1862_s1 + $0x2c0] sm:$0xff]  ;;  %v158_v27 = vld [vmem:[%s1862_s1 + $0x68] sm:$0xff]  ;;  %p1292_p12 = pnand %p1291_p11, %p1415_p5  ;;  %s1296_s29 = scalar_lea.vmem %s1295_s28, 256 }
  0x1c   : > { %249 = vmatprep.subr.mxu0 %v168_v9  ;;  %315 = vmatpush1.msra.mxu1 %v237_v19  ;;  %v232_v28 = vld [vmem:[%s1862_s1 + $0x2b8] sm:$0xff]  ;;  %v157_v29 = vld [vmem:[%s1862_s1 + $0x60] sm:$0xff]  ;;  %v231_v30 = vld [vmem:[%s1862_s1 + $0x2b0] sm:$0xff]  ;;  %p1297_p0 = scmp.lt.s32.totalorder %s1089_s6, %s1295_s28  ;;  %p1298_p1 = scmp.lt.s32.totalorder %s1296_s29, %s1290_s27 }
  0x1d   : > { %250 = vmatpush1.msra.mxu0 %v167_v10  ;;  %316 = vmatprep.subr.mxu1 %v236_v21  ;;  %v156_v31 = vld [vmem:[%s1862_s1 + $0x58] sm:$0xff]  ;;  %v230_v32 = vld [vmem:[%s1862_s1 + $0x2a8] sm:$0xff]  ;;  %v155_v33 = vld [vmem:[%s1862_s1 + $0x50] sm:$0xff]  ;;  %p1293_p13 = pneg %p1292_p12 }
  0x1e   : > { %251 = vmatprep.subr.mxu0 %v166_v11  ;;  %317 = vmatpush1.msra.mxu1 %v235_v22  ;;  %v229_v34 = vld [vmem:[%s1862_s1 + $0x2a0] sm:$0xff]  ;;  %v154_v35 = vld [vmem:[%s1862_s1 + $0x48] sm:$0xff]  ;;  %v228_v36 = vld [vmem:[%s1862_s1 + $0x298] sm:$0xff]  ;;  %p1299_p2 = por %p1298_p1, %p1297_p0 }
  0x1f   : > { %252 = vmatpush1.msra.mxu0 %v165_v12  ;;  %318 = vmatprep.subr.mxu1 %v234_v24  ;;  %v153_v37 = vld [vmem:[%s1862_s1 + $0x40] sm:$0xff]  ;;  %v227_v38 = vld [vmem:[%s1862_s1 + $0x290] sm:$0xff]  ;;  %v152_v39 = vld [vmem:[%s1862_s1 + $0x38] sm:$0xff] }
  0x20   : > { %253 = vmatprep.subr.mxu0 %v164_v13  ;;  %319 = vmatpush1.msra.mxu1 %v233_v26  ;;  %v226_v40 = vld [vmem:[%s1862_s1 + $0x288] sm:$0xff]  ;;  %v151_v41 = vld [vmem:[%s1862_s1 + $0x30] sm:$0xff]  ;;  %v225_v42 = vld [vmem:[%s1862_s1 + $0x280] sm:$0xff]  ;;  %p1300_p3 = pnand %p1299_p2, %p1293_p13 }
  0x21   : > { %254 = vmatpush1.msra.mxu0 %v163_v15  ;;  %320 = vmatprep.subr.mxu1 %v232_v28  ;;  %v150_v43 = vld [vmem:[%s1862_s1 + $0x28] sm:$0xff]  ;;  %v224_v44 = vld [vmem:[%s1862_s1 + $0x278] sm:$0xff]  ;;  %v149_v45 = vld [vmem:[%s1862_s1 + $0x20] sm:$0xff] }
  0x22   : > { %255 = vmatprep.subr.mxu0 %v162_v18  ;;  %321 = vmatpush1.msra.mxu1 %v231_v30  ;;  %v223_v46 = vld [vmem:[%s1862_s1 + $0x270] sm:$0xff]  ;;  %v148_v47 = vld [vmem:[%s1862_s1 + $0x18] sm:$0xff]  ;;  %v222_v48 = vld [vmem:[%s1862_s1 + $0x268] sm:$0xff] }
  0x23   : > { %256 = vmatpush1.msra.mxu0 %v161_v20  ;;  %322 = vmatprep.subr.mxu1 %v230_v32  ;;  %v147_v49 = vld [vmem:[%s1862_s1 + $0x10] sm:$0xff]  ;;  %v221_v50 = vld [vmem:[%s1862_s1 + $0x260] sm:$0xff]  ;;  %v146_v51 = vld [vmem:[%s1862_s1 + $0x8] sm:$0xff] }
  0x24   : > { %257 = vmatprep.subr.mxu0 %v160_v23  ;;  %323 = vmatpush1.msra.mxu1 %v229_v34  ;;  %v220_v52 = vld [vmem:[%s1862_s1 + $0x258] sm:$0xff]  ;;  %v145_v53 = vld [vmem:[%s1862_s1] sm:$0xff]  ;;  %v219_v54 = vld [vmem:[%s1862_s1 + $0x250] sm:$0xff] }
  0x25   : > { %258 = vmatpush1.msra.mxu0 %v159_v25  ;;  %324 = vmatprep.subr.mxu1 %v228_v36  ;;  %v208_v55 = vld [vmem:[%s1862_s1 + $0x1f8] sm:$0xff]  ;;  %v218_v56 = vld [vmem:[%s1862_s1 + $0x248] sm:$0xff]  ;;  %v207_v57 = vld [vmem:[%s1862_s1 + $0x1f0] sm:$0xff] }
  0x26   : > { %259 = vmatprep.subr.mxu0 %v158_v27  ;;  %325 = vmatpush1.msra.mxu1 %v227_v38  ;;  %v217_v58 = vld [vmem:[%s1862_s1 + $0x240] sm:$0xff]  ;;  %v206_v59 = vld [vmem:[%s1862_s1 + $0x1e8] sm:$0xff]  ;;  %v216_v60 = vld [vmem:[%s1862_s1 + $0x238] sm:$0xff] }
  0x27   : > { %260 = vmatpush1.msra.mxu0 %v157_v29  ;;  %326 = vmatprep.subr.mxu1 %v226_v40  ;;  %v205_v61 = vld [vmem:[%s1862_s1 + $0x1e0] sm:$0xff]  ;;  %v215_v62 = vld [vmem:[%s1862_s1 + $0x230] sm:$0xff]  ;;  %v204_v63 = vld [vmem:[%s1862_s1 + $0x1d8] sm:$0xff] }
  0x28   : > { %261 = vmatprep.subr.mxu0 %v156_v31  ;;  %327 = vmatpush1.msra.mxu1 %v225_v42  ;;  %v214_v0 = vld [vmem:[%s1862_s1 + $0x228] sm:$0xff]  ;;  %v203_v1 = vld [vmem:[%s1862_s1 + $0x1d0] sm:$0xff]  ;;  %v213_v2 = vld [vmem:[%s1862_s1 + $0x220] sm:$0xff] }
  0x29   : > { %262 = vmatpush1.msra.mxu0 %v155_v33  ;;  %328 = vmatprep.subr.mxu1 %v224_v44  ;;  %v202_v3 = vld [vmem:[%s1862_s1 + $0x1c8] sm:$0xff]  ;;  %v212_v5 = vld [vmem:[%s1862_s1 + $0x218] sm:$0xff]  ;;  %v201_v6 = vld [vmem:[%s1862_s1 + $0x1c0] sm:$0xff]  ;;  %v383_v44 = vlaneseq }
  0x2a   : > { %263 = vmatprep.subr.mxu0 %v154_v35  ;;  %329 = vmatpush1.msra.mxu1 %v223_v46  ;;  %v211_v7 = vld [vmem:[%s1862_s1 + $0x210] sm:$0xff]  ;;  %v200_v8 = vld [vmem:[%s1862_s1 + $0x1b8] sm:$0xff]  ;;  %v210_v9 = vld [vmem:[%s1862_s1 + $0x208] sm:$0xff] }
  0x2b   : > { %264 = vmatpush1.msra.mxu0 %v153_v37  ;;  %330 = vmatprep.subr.mxu1 %v222_v48  ;;  %v199_v10 = vld [vmem:[%s1862_s1 + $0x1b0] sm:$0xff]  ;;  %v209_v11 = vld [vmem:[%s1862_s1 + $0x200] sm:$0xff]  ;;  %v198_v12 = vld [vmem:[%s1862_s1 + $0x1a8] sm:$0xff]  ;;  %v1749_v46 = vand.u32 127, %v383_v44 }
  0x2c   : > { %265 = vmatprep.subr.mxu0 %v152_v39  ;;  %331 = vmatpush1.msra.mxu1 %v221_v50  ;;  %v144_v13 = vld [vmem:[%s1646_s5 + $0x10] sm:$0xff]  ;;  %v197_v14 = vld [vmem:[%s1862_s1 + $0x1a0] sm:$0xff]  ;;  %v143_v15 = vld [vmem:[%s1646_s5 + $0x8] sm:$0xff] }
  0x2d   : > { %266 = vmatpush1.msra.mxu0 %v151_v41  ;;  %332 = vmatprep.subr.mxu1 %v220_v52  ;;  %v196_v16 = vld [vmem:[%s1862_s1 + $0x198] sm:$0xff]  ;;  %v195_v17 = vld [vmem:[%s1862_s1 + $0x190] sm:$0xff]  ;;  %v194_v18 = vld [vmem:[%s1862_s1 + $0x188] sm:$0xff] }
  0x2e   : > { %267 = vmatprep.subr.mxu0 %v150_v43  ;;  %333 = vmatpush1.msra.mxu1 %v219_v54  ;;  %v193_v19 = vld [vmem:[%s1862_s1 + $0x180] sm:$0xff]  ;;  %v192_v20 = vld [vmem:[%s1862_s1 + $0x178] sm:$0xff]  ;;  %v191_v21 = vld [vmem:[%s1862_s1 + $0x170] sm:$0xff] }
  0x2f   : > { %268 = vmatpush1.msra.mxu0 %v149_v45  ;;  %334 = vmatprep.subr.mxu1 %v218_v56  ;;  %v190_v22 = vld [vmem:[%s1862_s1 + $0x168] sm:$0xff]  ;;  %v189_v23 = vld [vmem:[%s1862_s1 + $0x160] sm:$0xff]  ;;  %v188_v24 = vld [vmem:[%s1862_s1 + $0x158] sm:$0xff]  ;;  %v1747_v45 = vshrl.u32 %v383_v44, 7 }
  0x30   : > { %269 = vmatprep.subr.mxu0 %v148_v47  ;;  %335 = vmatpush1.msra.mxu1 %v217_v58  ;;  %v187_v25 = vld [vmem:[%s1862_s1 + $0x150] sm:$0xff]  ;;  %v186_v26 = vld [vmem:[%s1862_s1 + $0x148] sm:$0xff]  ;;  %v185_v27 = vld [vmem:[%s1862_s1 + $0x140] sm:$0xff] }
  0x31   : > { %270 = vmatpush1.msra.mxu0 %v147_v49  ;;  %336 = vmatprep.subr.mxu1 %v216_v60  ;;  %v184_v28 = vld [vmem:[%s1862_s1 + $0x138] sm:$0xff]  ;;  %v183_v29 = vld [vmem:[%s1862_s1 + $0x130] sm:$0xff]  ;;  %v182_v30 = vld [vmem:[%s1862_s1 + $0x128] sm:$0xff]  ;;  %vm387_vm2 = vcmp.le.s32.totalorder %v1749_v46, %v1747_v45 }
  0x32   : > { %271 = vmatprep.subr.mxu0 %v146_v51  ;;  %337 = vmatpush1.msra.mxu1 %v215_v62  ;;  %v181_v31 = vld [vmem:[%s1862_s1 + $0x120] sm:$0xff]  ;;  %v180_v32 = vld [vmem:[%s1862_s1 + $0x118] sm:$0xff]  ;;  %v179_v33 = vld [vmem:[%s1862_s1 + $0x110] sm:$0xff] }
  0x33   : > { %272 = vmatpush1.msra.mxu0 %v145_v53  ;;  %338 = vmatprep.subr.mxu1 %v214_v0  ;;  %v178_v34 = vld [vmem:[%s1862_s1 + $0x108] sm:$0xff]  ;;  %v177_v35 = vld [vmem:[%s1862_s1 + $0x100] sm:$0xff] }
  0x34   : > { %273 = vmatprep.subr.mxu0 %v208_v55  ;;  %339 = vmatpush1.msra.mxu1 %v213_v2  ;;  %v142_v36 = vld [vmem:[%s1646_s5] sm:$0xff]  ;;  %s1356_s5 = smov 112  }
  0x35   : > { %274 = vmatpush2.msra.mxu0 %v207_v57  ;;  %340 = vmatprep.subr.mxu1 %v212_v5 }
  0x36   : > { %275 = vmatprep.subr.mxu0 %v206_v59  ;;  %341 = vmatpush1.msra.mxu1 %v211_v7 }
  0x37   : > { %276 = vmatpush2.msra.mxu0 %v205_v61  ;;  %342 = vmatprep.subr.mxu1 %v210_v9 }
  0x38   : > { %277 = vmatprep.subr.mxu0 %v204_v63  ;;  %343 = vmatpush1.msra.mxu1 %v209_v11 }
  0x39   : > { %278 = vmatpush2.msra.mxu0 %v203_v1  ;;  %377 = vmatmul.mubr.f32.vlgmr.msra.gmra.mxu1 %v144_v13 }
  0x3a   : > { %279 = vmatprep.subr.mxu0 %v202_v3  ;;  %305 = vmatprep.mubr.f32.mxu0 %v143_v15 }
  0x3b   : > { %280 = vmatpush2.msra.mxu0 %v201_v6  ;;  %1185 = vmatprep.subr.mxu1 %v1352_v4 }
  0x3c   : > { %281 = vmatprep.subr.mxu0 %v200_v8  ;;  %1187 = vmatprep.mubr.msk.f32.mxu1 %vm1353_vm0, %v1352_v4 }
  0x3d   : > { %282 = vmatpush2.msra.mxu0 %v199_v10 }
  0x3e   : > { %283 = vmatprep.subr.mxu0 %v198_v12 }
  0x3f   : > { %284 = vmatpush2.msra.mxu0 %v197_v14 }
  0x40   : > { %285 = vmatprep.subr.mxu0 %v196_v16 }
  0x41   : > { %286 = vmatpush2.msra.mxu0 %v195_v17 }
  0x42   : > { %287 = vmatprep.subr.mxu0 %v194_v18 }
  0x43   : > { %288 = vmatpush2.msra.mxu0 %v193_v19 }
  0x44   : > { %289 = vmatprep.subr.mxu0 %v192_v20 }
  0x45   : > { %290 = vmatpush2.msra.mxu0 %v191_v21 }
  0x46   : > { %291 = vmatprep.subr.mxu0 %v190_v22 }
  0x47   : > { %292 = vmatpush2.msra.mxu0 %v189_v23 }
  0x48   : > { %293 = vmatprep.subr.mxu0 %v188_v24 }
  0x49   : > { %294 = vmatpush2.msra.mxu0 %v187_v25 }
  0x4a   : > { %295 = vmatprep.subr.mxu0 %v186_v26 }
  0x4b   : > { %296 = vmatpush2.msra.mxu0 %v185_v27 }
  0x4c   : > { %297 = vmatprep.subr.mxu0 %v184_v28 }
  0x4d   : > { %298 = vmatpush2.msra.mxu0 %v183_v29 }
  0x4e   : > { %299 = vmatprep.subr.mxu0 %v182_v30 }
  0x4f   : > { %300 = vmatpush2.msra.mxu0 %v181_v31 }
  0x50   : > { %301 = vmatprep.subr.mxu0 %v180_v32 }
  0x51   : > { %302 = vmatpush2.msra.mxu0 %v179_v33 }
  0x52   : > { %303 = vmatprep.subr.mxu0 %v178_v34 }
  0x53   : > { %304 = vmatpush2.msra.mxu0 %v177_v35 }
  0x54   : > { %306 = vmatmul.mubr.f32.vlgmr.msra.gmra.mxu0 %v142_v36 }
  0xf9   : > { %v378_v37 = vpop.f32.mrf.mxu1 }
  0xfb   : > { %v380_v42 = vpop.f32.mrf.mxu1 }
 0x114   : > { %v307_v38 = vpop.f32.mrf.mxu0 }
 0x115   : > { %v1732_v39 = vadd.f32 %v378_v37, %v307_v38 }
 0x116   : > { %v309_v40 = vpop.f32.mrf.mxu0 }
 0x117   : > { %555 = vrot.lane.b32.xlu1 %v1732_v39, %s1354_s30  ;;  %389 = vrot.lane.b32.xlu0 %v1732_v39, %s1355_s3  ;;  %v1739_v43 = vadd.f32 %v380_v42, %v309_v40 }
 0x189   : > { %v390_v41 = vpop.permute.xlu0 %389  ;;  %v556_v57 = vpop.permute.xlu1 %555 }
 0x18a   : > { %1186 = vmatpush3.xpose.msk.msra.mxu1 %vm391_vm1, %v390_v41 }
 0x18b   : > { %1190 = vmatprep.subr.mxu1 %v1352_v4 }
 0x18d   : > { %1188 = vmatmul.mubr.msk.f32.vlgmr.msra.gmra.mxu1 %vm391_vm1, %v1732_v39 }
 0x18e   : > { %1191 = vmatpush3.msra.mxu1 %v1739_v43  ;;  %1192 = vmatprep.mubr.msk.f32.mxu1 %vm1353_vm0, %v1352_v4 }
 0x18f   : > { %1195 = vmatprep.subr.mxu1 %v1352_v4 }
 0x24d   : > { %v462_v47 = vpop.f32.mrf.mxu1 }
 0x24e   : > { %v466_v48 = vmul.f32 0.25, %v462_v47 }
 0x24f   : > { %v1189_v49 = vpop.f32.mrf.mxu1 }
 0x250   : > { %v467_v50 = vsel %vm387_vm2, %v466_v48, -inf }
 0x251   : > { %v469_v51 = vsel %vm468_vm3, %v467_v50, -inf }
 0x252   : > { %470 = vmax.xlane.f32.xlu0 %v469_v51 }
 0x268   : > { %645 = vrot.lane.b32.xlu0 %v1739_v43, %s1356_s5 }
 0x2db   : > { %v471_v52 = vpop.xlane.xlu0 %470 }
 0x2dc   : > { %v472_v53 = vsub.f32 %v467_v50, %v471_v52 }
 0x2de   : > { %v473_v54 = vmul.f32 1.442695, %v472_v53 }
 0x2df   : > { %v646_v62 = vpop.permute.xlu0 %645 }
 0x2e0   : > { %1274 = vpow2.f32 %v473_v54 }
 0x2ed   : > { %v1275_v55 = vpop.eup %1274 }
 0x2ee   : > { %v475_v56 = vsel %vm468_vm3, %v1275_v55, 0.0 }
 0x2ef   : > { %476 = vadd.xlane.f32.xlu1 %v475_v56 }
 0x300   : > { %553 = vrot.lane.b32.xlu1 %v1732_v39, %s1356_s5 }
 0x378   : > { %v477_v58 = vpop.xlane.xlu1 %476 }
 0x379   : > { %1276 = vrcp.f32 %v477_v58 }
 0x37c   : > { %v554_v61 = vpop.permute.xlu1 %553 }
 0x386   : > { %v1277_v59 = vpop.eup %1276 }
 0x387   : > { %v479_v60 = vmul.f32 %v1277_v59, %v1275_v55 }
 0x389   : > { %1193 = vmatmul.mubr.msk.f32.vlgmr.msra.gmra.mxu1 %vm468_vm3, %v479_v60 }
 0x38a   : > { %1196 = vmatpush3.xpose.msk.msra.mxu1 %vm391_vm1, %v556_v57  ;;  %1197 = vmatprep.mubr.msk.f32.mxu1 %vm1353_vm0, %v1352_v4 }
 0x38b   : > { %1200 = vmatprep.subr.mxu1 %v1352_v4 }
 0x38d   : > { %1198 = vmatmul.mubr.msk.f32.vlgmr.msra.gmra.mxu1 %vm391_vm1, %v554_v61 }
 0x38e   : > { %1201 = vmatpush3.msra.mxu1 %v646_v62  ;;  %1202 = vmatprep.mubr.msk.f32.mxu1 %vm1353_vm0, %v1352_v4 }
 0x38f   : > { %1205 = vmatprep.subr.mxu1 %v1352_v4 }
 0x449   : > { %v1769_v63 = vpop.f32.mrf.mxu1 }
 0x44b   : > { %v1194_v0 = vpop.f32.mrf.mxu1 }
 0x44d   : > { %v627_v1 = vpop.f32.mrf.mxu1 }
 0x44e   : > { %v631_v2 = vmul.f32 0.25, %v627_v1 }
 0x44f   : > { %v1199_v3 = vpop.f32.mrf.mxu1 }
 0x450   : > { %v632_v5 = vsel %vm387_vm2, %v631_v2, -inf }
 0x451   : > { %v633_v6 = vsel %vm468_vm3, %v632_v5, -inf }
 0x452   : > { %634 = vmax.xlane.f32.xlu1 %v633_v6 }
 0x463   : > { %721 = vrot.lane.b32.xlu1 %v1732_v39, %s1357_s7 }
 0x4db   : > { %v635_v7 = vpop.xlane.xlu1 %634 }
 0x4dc   : > { %v636_v8 = vsub.f32 %v632_v5, %v635_v7 }
 0x4de   : > { %v637_v9 = vmul.f32 1.442695, %v636_v8 }
 0x4df   : > { %v722_v16 = vpop.permute.xlu1 %721 }
 0x4e0   : > { %1278 = vpow2.f32 %v637_v9 }
 0x4ed   : > { %v1279_v10 = vpop.eup %1278 }
 0x4ee   : > { %v639_v11 = vsel %vm468_vm3, %v1279_v10, 0.0 }
 0x4ef   : > { %640 = vadd.xlane.f32.xlu0 %v639_v11 }
 0x505   : > { %723 = vrot.lane.b32.xlu0 %v1732_v39, %s1358_s8 }
 0x578   : > { %v641_v12 = vpop.xlane.xlu0 %640 }
 0x579   : > { %1280 = vrcp.f32 %v641_v12 }
 0x57c   : > { %v724_v15 = vpop.permute.xlu0 %723 }
 0x586   : > { %v1281_v13 = vpop.eup %1280 }
 0x587   : > { %v643_v14 = vmul.f32 %v1281_v13, %v1279_v10 }
 0x589   : > { %1203 = vmatmul.mubr.msk.f32.vlgmr.msra.gmra.mxu1 %vm468_vm3, %v643_v14 }
 0x58a   : > { %1206 = vmatpush3.xpose.msk.msra.mxu1 %vm391_vm1, %v724_v15  ;;  %1207 = vmatprep.mubr.msk.f32.mxu1 %vm1353_vm0, %v1352_v4 }
 0x58b   : > { %1210 = vmatprep.subr.mxu1 %v1352_v4 }
 0x58d   : > { %1208 = vmatmul.mubr.msk.f32.vlgmr.msra.gmra.mxu1 %vm391_vm1, %v722_v16 }
 0x58e   : > { %1212 = vmatprep.mubr.msk.f32.mxu1 %vm1353_vm0, %v1352_v4 }
 0x649   : > { %v717_v17 = vpop.f32.mrf.mxu1 }
 0x64b   : > { %v1204_v18 = vpop.f32.mrf.mxu1 }
 0x64d   : > { %v795_v19 = vpop.f32.mrf.mxu1 }
 0x64e   : > { %v799_v20 = vmul.f32 0.25, %v795_v19 }
 0x64f   : > { %v1209_v21 = vpop.f32.mrf.mxu1 }
 0x650   : > { %v800_v22 = vsel %vm387_vm2, %v799_v20, -inf }
 0x651   : > { %v801_v23 = vsel %vm468_vm3, %v800_v22, -inf }
 0x652   : > { %802 = vmax.xlane.f32.xlu0 %v801_v23 }
 0x668   : > { %812 = vrot.lane.b32.xlu0 %v1739_v43, %s1357_s7 }
 0x66c   : > { %888 = vrot.lane.b32.xlu0 %v1732_v39, %s1359_s14 }
 0x6db   : > { %v803_v24 = vpop.xlane.xlu0 %802 }
 0x6dc   : > { %v804_v25 = vsub.f32 %v800_v22, %v803_v24 }
 0x6de   : > { %v805_v26 = vmul.f32 1.442695, %v804_v25 }
 0x6df   : > { %v813_v27 = vpop.permute.xlu0 %812 }
 0x6e0   : > { %1282 = vpow2.f32 %v805_v26  ;;  %1211 = vmatpush3.msra.mxu1 %v813_v27 }
 0x6e1   : > { %1215 = vmatprep.subr.mxu1 %v1352_v4 }
 0x6e3   : > { %v889_v34 = vpop.permute.xlu0 %888 }
 0x6ed   : > { %v1283_v28 = vpop.eup %1282 }
 0x6ee   : > { %v807_v29 = vsel %vm468_vm3, %v1283_v28, 0.0 }
 0x6ef   : > { %808 = vadd.xlane.f32.xlu1 %v807_v29 }
 0x700   : > { %890 = vrot.lane.b32.xlu1 %v1732_v39, %s1360_s16 }
 0x778   : > { %v809_v30 = vpop.xlane.xlu1 %808 }
 0x779   : > { %1284 = vrcp.f32 %v809_v30 }
 0x77c   : > { %v891_v33 = vpop.permute.xlu1 %890 }
 0x786   : > { %v1285_v31 = vpop.eup %1284 }
 0x787   : > { %v811_v32 = vmul.f32 %v1285_v31, %v1283_v28 }
 0x789   : > { %1213 = vmatmul.mubr.msk.f32.vlgmr.msra.gmra.mxu1 %vm468_vm3, %v811_v32 }
 0x78a   : > { %1216 = vmatpush3.xpose.msk.msra.mxu1 %vm391_vm1, %v891_v33  ;;  %1217 = vmatprep.mubr.msk.f32.mxu1 %vm1353_vm0, %v1352_v4 }
 0x78b   : > { %1220 = vmatprep.subr.mxu1 %v1352_v4 }
 0x78d   : > { %1218 = vmatmul.mubr.msk.f32.vlgmr.msra.gmra.mxu1 %vm391_vm1, %v889_v34 }
 0x78e   : > { %1222 = vmatprep.mubr.msk.f32.mxu1 %vm1353_vm0, %v1352_v4 }
 0x849   : > { %v884_v35 = vpop.f32.mrf.mxu1 }
 0x84b   : > { %v1214_v36 = vpop.f32.mrf.mxu1 }
 0x84d   : > { %v962_v37 = vpop.f32.mrf.mxu1 }
 0x84e   : > { %v966_v38 = vmul.f32 0.25, %v962_v37 }
 0x84f   : > { %v1219_v39 = vpop.f32.mrf.mxu1 }
 0x850   : > { %v967_v40 = vsel %vm387_vm2, %v966_v38, -inf }
 0x851   : > { %v968_v41 = vsel %vm468_vm3, %v967_v40, -inf }
 0x852   : > { %969 = vmax.xlane.f32.xlu0 %v968_v41 }
 0x868   : > { %979 = vrot.lane.b32.xlu0 %v1739_v43, %s1359_s14 }
 0x86c   : > { %1060 = vrot.lane.b32.xlu0 %v884_v35, %s1358_s8 }
 0x8db   : > { %v970_v42 = vpop.xlane.xlu0 %969 }
 0x8dc   : > { %v971_v44 = vsub.f32 %v967_v40, %v970_v42 }
 0x8de   : > { %v972_v4 = vmul.f32 1.442695, %v971_v44 }
 0x8df   : > { %v980_v47 = vpop.permute.xlu0 %979 }
 0x8e0   : > { %1286 = vpow2.f32 %v972_v4  ;;  %1221 = vmatpush3.msra.mxu1 %v980_v47 }
 0x8e3   : > { %v1061_v53 = vpop.permute.xlu0 %1060 }
 0x8ed   : > { %v1287_v48 = vpop.eup %1286 }
 0x8ee   : > { %v974_v49 = vsel %vm468_vm3, %v1287_v48, 0.0 }
 0x8ef   : > { %975 = vadd.xlane.f32.xlu1 %v974_v49 }
 0x900   : > { %1056 = vrot.lane.b32.xlu1 %v717_v17, %s1360_s16 }
 0x978   : > { %v976_v45 = vpop.xlane.xlu1 %975 }
 0x979   : > { %1288 = vrcp.f32 %v976_v45 }
 0x97c   : > { %v1057_v52 = vpop.permute.xlu1 %1056 }
 0x97d   : > { %v1067_v54 = vsel %vm391_vm1, %v1769_v63, %v1057_v52 }
 0x97e   : > { %v1069_v55 = vsel %vm1068_vm4, %v1067_v54, %v1061_v53 }
 0x986   : > { %v1289_v46 = vpop.eup %1288 }
 0x987   : > { %v978_v43 = vmul.f32 %v1289_v46, %v1287_v48 }
 0x989   : > { %1223 = vmatmul.mubr.msk.f32.vlgmr.msra.gmra.mxu1 %vm468_vm3, %v978_v43 }
 0xa49   : > { %v1051_v50 = vpop.f32.mrf.mxu1 }
 0xa4a   : > { %1064 = vrot.lane.b32.xlu0 %v1051_v50, %s1354_s30 }
 0xa4b   : > { %v1224_v51 = vpop.f32.mrf.mxu1 }
 0xabc   : > { %v1065_v56 = vpop.permute.xlu0 %1064 }
 0xabd   : > { %v1071_v57 = vsel %vm1070_vm5, %v1069_v55, %v1065_v56 }
 0xabe   : > { %1073 = vst.msk [vmem:[%s136_s22] sm:$0xff] %vm1072_vm6, %v1071_v57 }
 0xabf   : > { %1303 = shalt.err (!%p1300_p3)
}
 0xac0   : > { %s1304_s30 = scalar_lea.hbm %s1826_s25, 128  ;;  %s1308_s7 = scalar_lea.hbm %s1863_s2, 256 }
 0xac1   : > { %p1305_p4 = scmp.ne.s32.totalorder %s1826_s25, %s1304_s30  ;;  %p1309_p9 = scmp.lt.s32.totalorder %s1826_s25, %s1863_s2 }
 0xac2   : > { %p1310_p10 = scmp.lt.s32.totalorder %s1308_s7, %s1304_s30 }
 0xac3   : > { %p1306_p7 = pnand %p1305_p4, %p1415_p5 }
 0xac4   : > { %p1311_p11 = por %p1310_p10, %p1309_p9 }
 0xac5   : > { %p1307_p8 = pneg %p1306_p7 }
 0xac7   : > { %p1312_p12 = pnand %p1311_p11, %p1307_p8 }
 0xac9   : > { %1315 = shalt.err (!%p1312_p12)
}
 0xaca   : > { %1226 = dma.vmem_to_hbm [thread:$0]  (%p1415_p5), %s1089_s6, 128, %s1826_s25, %s1075_s26  }
 0xacb PF: > { %p1232_p13 = scmp.ge.s32.totalorder %s1350_s12, 2  ;;  %s1100_s16 = sand.u32 1, %s1338_s9  }
 0xacc   : > { %s1101_s17 = scalar_lea.sflag [#allocation3], %s1100_s16 }
 0xacd   : > { %p1229_p0 = pnand %p1232_p13, %p1419_p6 }
 0xacf   : > { %p1230_p1 = pneg %p1229_p0 }
 0xad1   : > { %1333 = dma.done.wait (%p1230_p1), %s1101_s17, 128  }
 0xad2   : > { %1335 = vsyncadd (%p1230_p1), %s1101_s17, 4294967168  ;;  %p12_p2 = scmp.ge.s32.totalorder %s1402_s15, 4   ;;  %s1866_s9 = smov %s1342_s10 }
 0xad3   : > { %s1867_s10 = smov %s1346_s11  ;;  %s1868_s11 = smov %s1413_s18 }
 0xad4   : > { %s1869_s12 = smov %s1402_s15  ;;  %14 = sbr.rel (!%p12_p2) target bundleno = 3 (0x3), region = 63 }
 0xad9   :  { %1106 = vsyncpa [#allocation3], 1 }
 0xada   :  { %1108 = vsyncpa [#allocation3 + $0x1], 1 }

</bundles_post_ra>
